<compile_context>
chip_gen: v5e
topology: v5e:2x2
jax: 0.10.0
libtpu: 0.0.40
codegen_flags: <defaults>
</compile_context>

<pallas_src>
import functools

import jax
import jax.numpy as jnp
from jax import lax
from jax.experimental import pallas as pl
from jax.experimental.pallas import tpu as pltpu


def _round_up(x, m):
    return ((x + m - 1) // m) * m


def mdn_kernel(x_ref, w_ref, b_ref, out_ref, *, num_latent, dk):
    """Fused MDN heads: one wide MXU matmul + per-segment activations.

    Column layout of the fused lane-dense output slab:
      [0, K)           -> pi        (softmax over these lanes only)
      [K, K+DK)        -> mu        (identity)
      [K+DK, K+2*DK)   -> sigma     (exp)
      [K+2*DK, N_pad)  -> zero padding (sliced off in the wrapper)
    """
    K = num_latent
    DK = dk

    # Single matmul for all three heads, full-f32 accumulate on the MXU.
    y = jnp.dot(x_ref[...], w_ref[...],
                preferred_element_type=jnp.float32,
                precision=lax.Precision.HIGHEST) + b_ref[...]

    # Segment masks (computed once per grid step; iota + 2 compares).
    col = lax.broadcasted_iota(jnp.int32, y.shape, 1)
    is_pi = col < K
    is_sigma = (col >= K + DK) & (col < K + 2 * DK)

    # Row max over the pi lanes only (other lanes masked to -inf).
    m = jnp.max(jnp.where(is_pi, y, -jnp.inf), axis=-1, keepdims=True)

    # ONE full-slab exp:
    #   pi lanes    -> exp(y - m)   (softmax numerator)
    #   sigma lanes -> exp(y)       (the sigma output itself)
    #   mu/pad lanes-> discarded by the final select.
    ey = jnp.exp(y - jnp.where(is_pi, m, 0.0))

    denom = jnp.sum(jnp.where(is_pi, ey, 0.0), axis=-1, keepdims=True)
    pi_vals = ey * (1.0 / denom)          # exact divide on a (TB,1) column

    # One lane-dense store of the combined slab.
    out_ref[...] = jnp.where(is_pi, pi_vals, jnp.where(is_sigma, ey, y))


def fuse_params(params, *, dim_out, num_latent):
    """Fuse the three heads into one padded (dim_in, N_pad) weight / (1, N_pad)
    bias. Call ONCE and reuse — do not rebuild per forward call."""
    wpi, bpi, wmu, bmu, wsg, bsg = params
    dim_in = wpi.shape[0]
    K = num_latent
    DK = dim_out * num_latent
    N = K + 2 * DK
    N_pad = _round_up(N, 128)            # lane-dense output width
    w = jnp.zeros((dim_in, N_pad), jnp.float32)
    w = w.at[:, :N].set(jnp.concatenate([wpi, wmu, wsg], axis=1))
    b = jnp.zeros((1, N_pad), jnp.float32)
    b = b.at[:, :N].set(jnp.concatenate([bpi, bmu, bsg], axis=1))
    return w, b


def mdn_forward(x, w_fused, b_fused, *, dim_out, num_latent, batch_tile=512):
    """MDN forward. x: (B, dim_in) f32 -> (pi, mu, sigma)."""
    B, dim_in = x.shape
    K = num_latent
    DK = dim_out * num_latent
    N_pad = w_fused.shape[1]

    # Batch tile: multiple of 8 sublanes; large (amortizes ~0.35us/step
    # pipeline overhead) but capped so the grid has >= 2 steps whenever B
    # allows it, so the "parallel" axis really feeds both v7x TensorCores.
    TB = min(batch_tile, _round_up(B, 8))
    if B > 8:
        TB = min(TB, _round_up(pl.cdiv(B, 2), 8))
    TB = max(8, _round_up(TB, 8))
    B_pad = _round_up(B, TB)
    if B_pad != B:
        x = jnp.pad(x, ((0, B_pad - B), (0, 0)))
    grid = (B_pad // TB,)

    kernel = functools.partial(mdn_kernel, num_latent=K, dk=DK)

    cost = pl.CostEstimate(
        flops=2 * B_pad * dim_in * N_pad,
        transcendentals=B_pad * N_pad,           # one full-slab exp
        bytes_accessed=4 * (B_pad * dim_in + dim_in * N_pad + N_pad
                            + B_pad * N_pad),
    )

    out = pl.pallas_call(
        kernel,
        out_shape=jax.ShapeDtypeStruct((B_pad, N_pad), jnp.float32),
        grid=grid,
        in_specs=[
            pl.BlockSpec((TB, dim_in), lambda i: (i, 0)),     # x: batch-tiled
            pl.BlockSpec((dim_in, N_pad), lambda i: (0, 0)),  # fused W: resident
            pl.BlockSpec((1, N_pad), lambda i: (0, 0)),       # fused b: resident
        ],
        out_specs=pl.BlockSpec((TB, N_pad), lambda i: (i, 0)),
        compiler_params=pltpu.CompilerParams(
            dimension_semantics=("parallel",)),   # shards batch over 2 TCs (v7x)
        cost_estimate=cost,
    )(x, w_fused, b_fused)

    # Layout glue matching the PyTorch .view(); a consumer that can eat the
    # fused (B, N_pad) slab directly should do so to skip this extra HBM pass.
    pi = out[:B, :K]
    mu = out[:B, K:K + DK].reshape(B, dim_out, num_latent)
    sigma = out[:B, K + DK:K + 2 * DK].reshape(B, dim_out, num_latent)
    return pi, mu, sigma


def init_params(key, dim_in, dim_out, num_latent):
    """Deterministic init mimicking nn.Linear default (uniform +-1/sqrt(fan_in)).
    Weights are stored transposed: (dim_in, out_features)."""
    DK = dim_out * num_latent
    bound = 1.0 / (dim_in ** 0.5)
    ks = jax.random.split(key, 6)
    u = lambda k, shape: jax.random.uniform(
        k, shape, jnp.float32, minval=-bound, maxval=bound)
    return (u(ks[0], (dim_in, num_latent)), u(ks[1], (1, num_latent)),
            u(ks[2], (dim_in, DK)), u(ks[3], (1, DK)),
            u(ks[4], (dim_in, DK)), u(ks[5], (1, DK)))


def mdn_reference(x, params, *, dim_out, num_latent):
    """Pure-JAX reference for correctness checking."""
    wpi, bpi, wmu, bmu, wsg, bsg = params
    hp = lax.Precision.HIGHEST
    pi = jax.nn.softmax(jnp.dot(x, wpi, precision=hp) + bpi[0], axis=-1)
    mu = (jnp.dot(x, wmu, precision=hp) + bmu[0]).reshape(
        -1, dim_out, num_latent)
    sigma = jnp.exp(jnp.dot(x, wsg, precision=hp) + bsg[0]).reshape(
        -1, dim_out, num_latent)
    return pi, mu, sigma


if __name__ == "__main__":
    # Multi-tile problem: grid of 2 batch tiles of 128 rows.
    B, dim_in, dim_out, num_latent = 256, 32, 4, 8

    key = jax.random.PRNGKey(0)
    kx, kp = jax.random.split(key)
    x = jax.random.normal(kx, (B, dim_in), jnp.float32)
    params = init_params(kp, dim_in, dim_out, num_latent)

    # Fuse / pad the head weights ONCE (cached outside the forward).
    w_fused, b_fused = fuse_params(params, dim_out=dim_out,
                                   num_latent=num_latent)

    fwd = jax.jit(functools.partial(
        mdn_forward, dim_out=dim_out, num_latent=num_latent, batch_tile=512))
    pi, mu, sigma = fwd(x, w_fused, b_fused)
    jax.block_until_ready((pi, mu, sigma))

    # Correctness check vs pure-JAX reference.
    pi_r, mu_r, sg_r = mdn_reference(x, params, dim_out=dim_out,
                                     num_latent=num_latent)
    assert pi.shape == (B, num_latent)
    assert mu.shape == (B, dim_out, num_latent)
    assert sigma.shape == (B, dim_out, num_latent)
    assert jnp.allclose(pi, pi_r, atol=1e-4, rtol=1e-3)
    assert jnp.allclose(mu, mu_r, atol=1e-4, rtol=1e-3)
    assert jnp.allclose(sigma, sg_r, atol=1e-4, rtol=1e-3)
    assert jnp.allclose(jnp.sum(pi, axis=-1), 1.0, atol=1e-5)

    print("KERNEL_OK")
</pallas_src>

<mosaic_0001>
module attributes {stable_mosaic.version = 11 : i64} {
  func.func @mdn_kernel(%arg0: i32, %arg1: memref<128x32xf32, #tpu.memory_space<vmem>>, %arg2: memref<32x128xf32, #tpu.memory_space<vmem>>, %arg3: memref<1x128xf32, #tpu.memory_space<vmem>>, %arg4: memref<128x128xf32, #tpu.memory_space<vmem>>) attributes {dimension_semantics = [#tpu.dimension_semantics<parallel>], iteration_bounds = array<i64: 2>, scalar_prefetch = 0 : i64, scratch_operands = 0 : i64, tpu.core_type = #tpu.core_type<tc>, window_params = [{transform_indices = @transform_0, window_bounds = array<i64: 128, 32>}, {pipeline_mode = #tpu.pipeline_mode<synchronous>, transform_indices = @transform_1, window_bounds = array<i64: 32, 128>}, {pipeline_mode = #tpu.pipeline_mode<synchronous>, transform_indices = @transform_2, window_bounds = array<i64: 1, 128>}, {transform_indices = @transform_3, window_bounds = array<i64: 128, 128>}]} {
    %c0 = arith.constant 0 : index
    %c0_0 = arith.constant 0 : index
    %0 = vector.load %arg1[%c0, %c0_0] : memref<128x32xf32, #tpu.memory_space<vmem>>, vector<128x32xf32>
    %c0_1 = arith.constant 0 : index
    %c0_2 = arith.constant 0 : index
    %1 = vector.load %arg2[%c0_1, %c0_2] : memref<32x128xf32, #tpu.memory_space<vmem>>, vector<32x128xf32>
    %cst = arith.constant dense<0.000000e+00> : vector<128x128xf32>
    %2 = tpu.matmul %0, %1, %cst {dimension_numbers = #tpu.dot_dimension_numbers<[1], [0], [0], [1], [0, 0, 1, 1], [], []>, precision = #tpu.contract_precision<fp32>} : vector<128x32xf32>, vector<32x128xf32>, vector<128x128xf32> -> vector<128x128xf32>
    %c0_3 = arith.constant 0 : index
    %c0_4 = arith.constant 0 : index
    %3 = vector.load %arg3[%c0_3, %c0_4] : memref<1x128xf32, #tpu.memory_space<vmem>>, vector<1x128xf32>
    %4 = vector.broadcast %3 : vector<1x128xf32> to vector<128x128xf32>
    %5 = arith.addf %2, %4 : vector<128x128xf32>
    %6 = tpu.iota {dimensions = array<i32: 1>} : vector<128x128xi32>
    %c8_i32 = arith.constant 8 : i32
    %7 = vector.broadcast %c8_i32 : i32 to vector<128x128xi32>
    %8 = arith.cmpi slt, %6, %7 : vector<128x128xi32>
    %c40_i32 = arith.constant 40 : i32
    %9 = vector.broadcast %c40_i32 : i32 to vector<128x128xi32>
    %10 = arith.cmpi sge, %6, %9 : vector<128x128xi32>
    %c72_i32 = arith.constant 72 : i32
    %11 = vector.broadcast %c72_i32 : i32 to vector<128x128xi32>
    %12 = arith.cmpi slt, %6, %11 : vector<128x128xi32>
    %13 = arith.andi %10, %12 : vector<128x128xi1>
    %cst_5 = arith.constant 0xFF800000 : f32
    %14 = vector.broadcast %cst_5 : f32 to vector<128x128xf32>
    %15 = arith.select %8, %5, %14 : vector<128x128xi1>, vector<128x128xf32>
    %cst_6 = arith.constant dense<0xFF800000> : vector<128xf32>
    %16 = vector.multi_reduction <maximumf>, %15, %cst_6 [1] : vector<128x128xf32> to vector<128xf32>
    %17 = vector.shape_cast %16 : vector<128xf32> to vector<128x1xf32>
    %cst_7 = arith.constant 0.000000e+00 : f32
    %18 = vector.shape_cast %17 : vector<128x1xf32> to vector<128x1xf32>
    %19 = vector.broadcast %18 : vector<128x1xf32> to vector<128x128xf32>
    %20 = vector.broadcast %cst_7 : f32 to vector<128x128xf32>
    %21 = arith.select %8, %19, %20 : vector<128x128xi1>, vector<128x128xf32>
    %22 = arith.subf %5, %21 : vector<128x128xf32>
    %23 = math.exp %22 : vector<128x128xf32>
    %cst_8 = arith.constant 0.000000e+00 : f32
    %24 = vector.broadcast %cst_8 : f32 to vector<128x128xf32>
    %25 = arith.select %8, %23, %24 : vector<128x128xi1>, vector<128x128xf32>
    %cst_9 = arith.constant dense<0.000000e+00> : vector<128xf32>
    %26 = vector.multi_reduction <add>, %25, %cst_9 [1] : vector<128x128xf32> to vector<128xf32>
    %27 = vector.shape_cast %26 : vector<128xf32> to vector<128x1xf32>
    %cst_10 = arith.constant 1.000000e+00 : f32
    %28 = vector.broadcast %cst_10 : f32 to vector<128x1xf32>
    %29 = arith.divf %28, %27 : vector<128x1xf32>
    %30 = vector.broadcast %29 : vector<128x1xf32> to vector<128x128xf32>
    %31 = arith.mulf %23, %30 : vector<128x128xf32>
    %32 = arith.select %13, %23, %5 : vector<128x128xi1>, vector<128x128xf32>
    %33 = arith.select %8, %31, %32 : vector<128x128xi1>, vector<128x128xf32>
    %c0_11 = arith.constant 0 : index
    %c0_12 = arith.constant 0 : index
    %34 = vector.load %arg4[%c0_11, %c0_12] : memref<128x128xf32, #tpu.memory_space<vmem>>, vector<128x128xf32>
    tpu.vector_store %arg4[%c0_11, %c0_12], %33 {strides = array<i32>} : memref<128x128xf32, #tpu.memory_space<vmem>>, vector<128x128xf32>,
    return
  }
  func.func @transform_0(%arg0: i32) -> (i32, i32) {
    %c0_i32 = arith.constant 0 : i32
    %c0_i32_0 = arith.constant 0 : i32
    return %arg0, %c0_i32 : i32, i32
  }
  func.func @transform_1(%arg0: i32) -> (i32, i32) {
    %c0_i32 = arith.constant 0 : i32
    %c0_i32_0 = arith.constant 0 : i32
    %c0_i32_1 = arith.constant 0 : i32
    return %c0_i32, %c0_i32_0 : i32, i32
  }
  func.func @transform_2(%arg0: i32) -> (i32, i32) {
    %c0_i32 = arith.constant 0 : i32
    %c0_i32_0 = arith.constant 0 : i32
    %c0_i32_1 = arith.constant 0 : i32
    return %c0_i32, %c0_i32_0 : i32, i32
  }
  func.func @transform_3(%arg0: i32) -> (i32, i32) {
    %c0_i32 = arith.constant 0 : i32
    %c0_i32_0 = arith.constant 0 : i32
    return %arg0, %c0_i32 : i32, i32
  }
}

</mosaic_0001>

<bundles_post_ra>
// kernel: mdn_forward.1
= control target key start
LH: loop header
LB: loop body
LE: loop exit
PB: predicated region body
PF: predicated region fallthrough
CT: control target
= control target key end

     0   :  { %s1543_s12 = smov 0   ;;  %s2302_s0 = inlined_call_operand.vmem [shape: f32[256,32], index: 0, kind: input, shape index: {}]   ;;  %s2303_s1 = inlined_call_operand.vmem [shape: f32[32,128], index: 1, kind: input, shape index: {}]   ;;  %s2304_s2 = inlined_call_operand.vmem [shape: f32[1,128], index: 2, kind: input, shape index: {}]   ;;  %s2305_s3 = inlined_call_operand.vmem [shape: f32[256,128], index: 3, kind: output, shape index: {}]  }
   0x1 LB: > { %s1423_s13 = sadd.s32 4294967295, %s1521_s12   ;;  %p1427_p0 = scmp.ge.s32.totalorder %s1521_s12, 1  ;;  %s1521_s12 = sphi %s1543_s12, %s13_s12  }
   0x2   : > { %p138_p1 = scmp.lt.s32.totalorder %s1521_s12, 3 }
   0x4   : > { %p139_p2 = pnand %p1427_p0, %p138_p1 }
   0x5   : > { %s1428_s20 = sshll.u32 (!%p139_p2), %s1423_s13, 4 }
   0x6   : > { %142 = sbr.rel (%p139_p2) target bundleno = 622 (0x26e), region = 32  ;;  %p163_p3 = scmp.lt.s32.totalorder (!%p139_p2), %s1428_s20, 31 }
   0xb   : > { %v193_v0 = vld [vmem:[%s2303_s1 + $0x18] sm:$0xff]  ;;  %v192_v1 = vld [vmem:[%s2303_s1 + $0x10] sm:$0xff]  ;;  %v191_v2 = vld [vmem:[%s2303_s1 + $0x8] sm:$0xff]  ;;  %s2309_s20 = smov (!%p163_p3, %s1428_s20), 31  ;;  %vm198_vm0 = vcmask 261120  }
   0xc   : > { %v1560_v3 = vand.u32 4294901760, %v193_v0  ;;  %v1562_v4 = vand.u32 4294901760, %v192_v1  ;;  %v1564_v5 = vand.u32 4294901760, %v191_v2  ;;  %v190_v6 = vld [vmem:[%s2303_s1] sm:$0xff]  ;;  %s1429_s23 = sshll.u32 %s2309_s20, 3 }
   0xd   : > { %v1569_v7 = vand.u32 4294901760, %v190_v6  ;;  %s1589_s26 = scalar_lea.vmem %s2302_s0, %s1429_s23  ;;  %s2169_s4 = scalar_lea.vmem %s2305_s3, %s1429_s23 }
   0xe   : > { %1434 = vmatpush.msra.mxu2 %v1560_v3  ;;  %v409_v8 = vsub.f32 %v193_v0, %v1560_v3  ;;  %v415_v9 = vsub.f32 %v192_v1, %v1562_v4  ;;  %v421_v10 = vsub.f32 %v191_v2, %v1564_v5  ;;  %260 = vmatpush.msra.mxu0 %v1560_v3  ;;  %v182_v19 = vld [vmem:[%s1589_s26 + $0x40] sm:$0xff]  ;;  %v183_v20 = vld [vmem:[%s1589_s26 + $0x48] sm:$0xff]  ;;  %v184_v30 = vld [vmem:[%s1589_s26 + $0x50] sm:$0xff] }
   0xf   : > { %v1579_v11 = vsub.f32 %v190_v6, %v1569_v7  ;;  %v174_v21 = vld [vmem:[%s1589_s26] sm:$0xff]  ;;  %v224_v22 = vsel %vm198_vm0, %v182_v19, 0  ;;  %v227_v23 = vsel %vm198_vm0, %v183_v20, 0  ;;  %v175_v25 = vld [vmem:[%s1589_s26 + $0x8] sm:$0xff]  ;;  %v176_v33 = vld [vmem:[%s1589_s26 + $0x10] sm:$0xff]  ;;  %v230_v39 = vsel %vm198_vm0, %v184_v30, 0 }
  0x10   : > { %1435 = vmatpush.msra.mxu2 %v1562_v4  ;;  %v410_v12 = vand.u32 4294901760, %v409_v8  ;;  %v416_v13 = vand.u32 4294901760, %v415_v9  ;;  %v422_v14 = vand.u32 4294901760, %v421_v10  ;;  %262 = vmatpush.msra.mxu0 %v1562_v4  ;;  %v200_v24 = vsel %vm198_vm0, %v174_v21, 0  ;;  %v185_v53 = vld [vmem:[%s1589_s26 + $0x58] sm:$0xff]  ;;  %v186_v6 = vld [vmem:[%s1589_s26 + $0x60] sm:$0xff] }
  0x11   : > { %v428_v15 = vand.u32 4294901760, %v1579_v11  ;;  %v1602_v28 = vand.u32 4294901760, %v224_v22  ;;  %v1607_v31 = vand.u32 4294901760, %v227_v23  ;;  %v1609_v32 = vand.u32 4294901760, %v200_v24  ;;  %v177_v55 = vld [vmem:[%s1589_s26 + $0x18] sm:$0xff]  ;;  %v179_v19 = vld [vmem:[%s1589_s26 + $0x28] sm:$0xff] }
  0x12   : > { %v411_v16 = vsub.f32 %v409_v8, %v410_v12  ;;  %1436 = vmatpush.msra.mxu2 %v1564_v5  ;;  %v417_v17 = vsub.f32 %v415_v9, %v416_v13  ;;  %v423_v18 = vsub.f32 %v421_v10, %v422_v14  ;;  %264 = vmatpush.msra.mxu0 %v1564_v5  ;;  %v203_v36 = vsel %vm198_vm0, %v175_v25, 0 }
  0x13   : > { %v429_v29 = vsub.f32 %v1579_v11, %v428_v15  ;;  %v1613_v35 = vsub.f32 %v224_v22, %v1602_v28  ;;  %v1617_v37 = vsub.f32 %v227_v23, %v1607_v31  ;;  %v1620_v38 = vsub.f32 %v200_v24, %v1609_v32 }
  0x14   : > { %v412_v26 = vand.u32 4294901760, %v411_v16  ;;  %v418_v27 = vand.u32 4294901760, %v417_v17  ;;  %1437 = vmatpush.msra.mxu2 %v1569_v7  ;;  %266 = vmatpush.msra.mxu0 %v1569_v7  ;;  %v424_v34 = vand.u32 4294901760, %v423_v18  ;;  %v1623_v40 = vand.u32 4294901760, %v203_v36  ;;  %v187_v18 = vld [vmem:[%s1589_s26 + $0x68] sm:$0xff] }
  0x15   : > { %v333_v41 = vand.u32 4294901760, %v1613_v35  ;;  %v430_v42 = vand.u32 4294901760, %v429_v29  ;;  %v206_v43 = vsel %vm198_vm0, %v176_v33, 0  ;;  %v269_v44 = vand.u32 4294901760, %v1620_v38 }
  0x16   : > { %511 = vmatpush.msrb.mxu2 %v409_v8  ;;  %734 = vmatpush.msrb.mxu0 %v410_v12  ;;  %v1629_v45 = vsub.f32 %v203_v36, %v1623_v40  ;;  %v341_v47 = vand.u32 4294901760, %v1617_v37  ;;  %v1635_v48 = vand.u32 4294901760, %v230_v39  ;;  %v1641_v51 = vand.u32 4294901760, %v206_v43  ;;  %v188_v36 = vld [vmem:[%s1589_s26 + $0x70] sm:$0xff] }
  0x17   : > { %1438 = vmatpush.msra.mxu3 %v412_v26  ;;  %413 = vmatpush.msra.mxu1 %v412_v26  ;;  %v334_v46 = vsub.f32 %v1613_v35, %v333_v41  ;;  %v270_v49 = vsub.f32 %v1620_v38, %v269_v44  ;;  %v233_v59 = vsel %vm198_vm0, %v185_v53, 0  ;;  %v209_v61 = vsel %vm198_vm0, %v177_v55, 0 }
  0x18   : > { %514 = vmatpush.msrb.mxu2 %v415_v9  ;;  %738 = vmatpush.msrb.mxu0 %v416_v13  ;;  %v277_v50 = vand.u32 4294901760, %v1629_v45  ;;  %v342_v56 = vsub.f32 %v1617_v37, %v341_v47  ;;  %v1653_v57 = vsub.f32 %v230_v39, %v1635_v48  ;;  %v1661_v60 = vsub.f32 %v206_v43, %v1641_v51  ;;  %v180_v39 = vld [vmem:[%s1589_s26 + $0x30] sm:$0xff] }
  0x19   : > { %1439 = vmatpush.msra.mxu3 %v418_v27  ;;  %419 = vmatpush.msra.mxu1 %v418_v27  ;;  %v335_v52 = vand.u32 4294901760, %v334_v46  ;;  %v271_v54 = vand.u32 4294901760, %v270_v49  ;;  %v1667_v0 = vand.u32 4294901760, %v233_v59  ;;  %v239_v23 = vsel %vm198_vm0, %v187_v18, 0 }
  0x1a   : > { %517 = vmatpush.msrb.mxu2 %v421_v10  ;;  %742 = vmatpush.msrb.mxu0 %v422_v14  ;;  %v278_v58 = vsub.f32 %v1629_v45, %v277_v50  ;;  %v343_v62 = vand.u32 4294901760, %v342_v56  ;;  %v349_v63 = vand.u32 4294901760, %v1653_v57  ;;  %v285_v2 = vand.u32 4294901760, %v1661_v60 }
  0x1b   : > { %1440 = vmatpush.msra.mxu3 %v424_v34  ;;  %425 = vmatpush.msra.mxu1 %v424_v34  ;;  %v1683_v9 = vsub.f32 %v233_v59, %v1667_v0  ;;  %v236_v10 = vsel %vm198_vm0, %v186_v6, 0  ;;  %v215_v25 = vsel %vm198_vm0, %v179_v19, 0  ;;  %v1719_v29 = vand.u32 4294901760, %v239_v23 }
  0x1c   : > { %520 = vmatpush.msrb.mxu2 %v1579_v11  ;;  %746 = vmatpush.msrb.mxu0 %v428_v15  ;;  %v279_v1 = vand.u32 4294901760, %v278_v58  ;;  %v350_v8 = vsub.f32 %v1653_v57, %v349_v63  ;;  %v1695_v15 = vand.u32 4294901760, %v236_v10  ;;  %v1722_v34 = vand.u32 4294901760, %v215_v25 }
  0x1d   : > { %1441 = vmatpush.msra.mxu3 %v430_v42  ;;  %431 = vmatpush.msra.mxu1 %v430_v42  ;;  %v357_v14 = vand.u32 4294901760, %v1683_v9  ;;  %v1732_v43 = vsub.f32 %v239_v23, %v1719_v29  ;;  %v242_v49 = vsel %vm198_vm0, %v188_v36, 0  ;;  %v218_v53 = vsel %vm198_vm0, %v180_v39, 0 }
  0x1e   : > { %465 = vmatmul.f32.vlgmr.msra.gmra.mxu3 %v1602_v28  ;;  %433 = vmatmul.f32.vlgmr.msra.gmra.mxu1 %v1609_v32  ;;  %v351_v13 = vand.u32 4294901760, %v350_v8  ;;  %v1708_v21 = vsub.f32 %v236_v10, %v1695_v15  ;;  %v1743_v56 = vand.u32 4294901760, %v242_v49 }
  0x1f   : > { %336 = vmatmul.f32.vlgmr.msra.gmra.mxu2 %v335_v52  ;;  %615 = vmatpush.msrb.mxu3 %v1560_v3  ;;  %v358_v20 = vsub.f32 %v1683_v9, %v357_v14  ;;  %v1739_v52 = vsub.f32 %v215_v25, %v1722_v34  ;;  %v373_v55 = vand.u32 4294901760, %v1732_v43 }
  0x20   : > { %272 = vmatmul.f32.vlgmr.msra.gmra.mxu0 %v271_v54  ;;  %825 = vmatpush.msrb.mxu1 %v1560_v3  ;;  %v1671_v3 = vand.u32 4294901760, %v209_v61  ;;  %v365_v27 = vand.u32 4294901760, %v1708_v21 }
  0x21   : > { %617 = vmatpush.msrb.mxu3 %v1562_v4  ;;  %v359_v26 = vand.u32 4294901760, %v358_v20  ;;  %v309_v59 = vand.u32 4294901760, %v1739_v52  ;;  %v374_v6 = vsub.f32 %v1732_v43, %v373_v55 }
  0x22   : > { %827 = vmatpush.msrb.mxu1 %v1562_v4  ;;  %v178_v4 = vld [vmem:[%s1589_s26 + $0x20] sm:$0xff]  ;;  %v1691_v11 = vsub.f32 %v209_v61, %v1671_v3  ;;  %v366_v42 = vsub.f32 %v1708_v21, %v365_v27  ;;  %v1746_v61 = vand.u32 4294901760, %v218_v53 }
  0x23   : > { %619 = vmatpush.msrb.mxu3 %v1564_v5  ;;  %v212_v12 = vsel %vm198_vm0, %v178_v4, 0  ;;  %v1756_v4 = vsub.f32 %v242_v49, %v1743_v56  ;;  %v310_v8 = vsub.f32 %v1739_v52, %v309_v59 }
  0x24   : > { %829 = vmatpush.msrb.mxu1 %v1564_v5  ;;  %v286_v5 = vsub.f32 %v1661_v60, %v285_v2  ;;  %v1698_v17 = vand.u32 4294901760, %v212_v12  ;;  %v367_v54 = vand.u32 4294901760, %v366_v42  ;;  %v316_v10 = vsub.f32 %v218_v53, %v1746_v61 }
  0x25   : > { %621 = vmatpush.msrb.mxu3 %v1569_v7  ;;  %v311_v19 = vand.u32 4294901760, %v310_v8 }
  0x26   : > { %469 = vmatmul.f32.gmra.mxu3 %v1607_v31  ;;  %437 = vmatmul.f32.gmra.mxu1 %v1623_v40  ;;  %v287_v16 = vand.u32 4294901760, %v286_v5  ;;  %v1715_v24 = vsub.f32 %v212_v12, %v1698_v17  ;;  %v317_v20 = vand.u32 4294901760, %v316_v10 }
  0x27   : > { %344 = vmatmul.f32.gmra.mxu2 %v343_v62  ;;  %831 = vmatpush.msrb.mxu1 %v1569_v7  ;;  %v293_v7 = vand.u32 4294901760, %v1691_v11  ;;  %v189_v62 = vld [vmem:[%s1589_s26 + $0x78] sm:$0xff] }
  0x28   : > { %280 = vmatmul.f32.gmra.mxu0 %v279_v1  ;;  %v301_v33 = vand.u32 4294901760, %v1715_v24  ;;  %v181_v1 = vld [vmem:[%s1589_s26 + $0x38] sm:$0xff]  ;;  %v245_v5 = vsel %vm198_vm0, %v189_v62, 0 }
  0x29   : > { %v294_v22 = vsub.f32 %v1691_v11, %v293_v7  ;;  %v221_v12 = vsel %vm198_vm0, %v181_v1, 0  ;;  %v1765_v18 = vand.u32 4294901760, %v245_v5 }
  0x2a   : > { %v302_v46 = vsub.f32 %v1715_v24, %v301_v33 }
  0x2b   : > { %v295_v30 = vand.u32 4294901760, %v294_v22  ;;  %v323_v22 = vand.u32 4294901760, %v221_v12  ;;  %v1773_v25 = vsub.f32 %v245_v5, %v1765_v18 }
  0x2c   : > { %v303_v58 = vand.u32 4294901760, %v302_v46 }
  0x2d   : > { %v389_v39 = vand.u32 4294901760, %v1773_v25 }
  0x2e   : > { %473 = vmatmul.f32.gmra.mxu3 %v1635_v48  ;;  %441 = vmatmul.f32.gmra.mxu1 %v1641_v51 }
  0x2f   : > { %352 = vmatmul.f32.gmra.mxu2 %v351_v13  ;;  %v375_v13 = vand.u32 4294901760, %v374_v6  ;;  %v390_v49 = vsub.f32 %v1773_v25, %v389_v39 }
  0x30   : > { %288 = vmatmul.f32.gmra.mxu0 %v287_v16  ;;  %v381_v16 = vand.u32 4294901760, %v1756_v4 }
  0x32   : > { %v382_v23 = vsub.f32 %v1756_v4, %v381_v16 }
  0x34   : > { %v383_v36 = vand.u32 4294901760, %v382_v23 }
  0x36   : > { %477 = vmatmul.f32.gmra.mxu3 %v1667_v0  ;;  %445 = vmatmul.f32.gmra.mxu1 %v1671_v3 }
  0x37   : > { %360 = vmatmul.f32.gmra.mxu2 %v359_v26  ;;  %v318_v26 = vsub.f32 %v316_v10, %v317_v20 }
  0x38   : > { %296 = vmatmul.f32.gmra.mxu0 %v295_v30  ;;  %v324_v30 = vsub.f32 %v221_v12, %v323_v22 }
  0x39   : > { %v319_v42 = vand.u32 4294901760, %v318_v26  ;;  %v897_v26 = vlaneseq }
  0x3a   : > { %v325_v46 = vand.u32 4294901760, %v324_v30 }
  0x3c   : > { %v326_v53 = vsub.f32 %v324_v30, %v325_v46 }
  0x3e   : > { %481 = vmatmul.f32.gmra.mxu3 %v1695_v15  ;;  %449 = vmatmul.f32.gmra.mxu1 %v1698_v17 }
  0x3f   : > { %368 = vmatmul.f32.gmra.mxu2 %v367_v54  ;;  %v391_v54 = vand.u32 4294901760, %v390_v49 }
  0x40   : > { %304 = vmatmul.f32.gmra.mxu0 %v303_v58  ;;  %v327_v58 = vand.u32 4294901760, %v326_v53 }
  0x46   : > { %485 = vmatmul.f32.gmra.mxu3 %v1719_v29  ;;  %453 = vmatmul.f32.gmra.mxu1 %v1722_v34 }
  0x47   : > { %376 = vmatmul.f32.gmra.mxu2 %v375_v13 }
  0x48   : > { %312 = vmatmul.f32.gmra.mxu0 %v311_v19 }
  0x4e   : > { %489 = vmatmul.f32.gmra.mxu3 %v1743_v56  ;;  %457 = vmatmul.f32.gmra.mxu1 %v1746_v61 }
  0x4f   : > { %384 = vmatmul.f32.gmra.mxu2 %v383_v36 }
  0x50   : > { %320 = vmatmul.f32.gmra.mxu0 %v319_v42 }
  0x56   : > { %493 = vmatmul.f32.gmra.mxu3 %v1765_v18  ;;  %461 = vmatmul.f32.gmra.mxu1 %v323_v22 }
  0x57   : > { %392 = vmatmul.f32.gmra.mxu2 %v391_v54 }
  0x58   : > { %328 = vmatmul.f32.gmra.mxu0 %v327_v58 }
  0x5e   : > { %625 = vmatmul.f32.vlgmr.msrb.gmra.mxu3 %v269_v44  ;;  %833 = vmatmul.f32.vlgmr.msrb.gmra.mxu1 %v1609_v32 }
  0x5f   : > { %523 = vmatmul.f32.vlgmr.msrb.gmra.mxu2 %v1620_v38 }
  0x60   : > { %748 = vmatmul.f32.vlgmr.msrb.gmra.mxu0 %v1609_v32 }
  0x66   : > { %631 = vmatmul.f32.gmra.mxu3 %v277_v50  ;;  %837 = vmatmul.f32.gmra.mxu1 %v1623_v40 }
  0x67   : > { %528 = vmatmul.f32.gmra.mxu2 %v1629_v45 }
  0x68   : > { %752 = vmatmul.f32.gmra.mxu0 %v1623_v40  ;;  %v1825_v40 = vld [vmem:[%s2304_s2] ss:$0 sm:$0xff] }
  0x6e   : > { %637 = vmatmul.f32.gmra.mxu3 %v285_v2  ;;  %841 = vmatmul.f32.gmra.mxu1 %v1641_v51 }
  0x6f   : > { %533 = vmatmul.f32.gmra.mxu2 %v1661_v60 }
  0x70   : > { %756 = vmatmul.f32.gmra.mxu0 %v1641_v51 }
  0x76   : > { %643 = vmatmul.f32.gmra.mxu3 %v293_v7  ;;  %845 = vmatmul.f32.gmra.mxu1 %v1671_v3 }
  0x77   : > { %538 = vmatmul.f32.gmra.mxu2 %v1691_v11 }
  0x78   : > { %760 = vmatmul.f32.gmra.mxu0 %v1671_v3 }
  0x7e   : > { %649 = vmatmul.f32.gmra.mxu3 %v301_v33  ;;  %849 = vmatmul.f32.gmra.mxu1 %v1698_v17 }
  0x7f   : > { %543 = vmatmul.f32.gmra.mxu2 %v1715_v24 }
  0x80   : > { %764 = vmatmul.f32.gmra.mxu0 %v1698_v17 }
  0x86   : > { %655 = vmatmul.f32.gmra.mxu3 %v309_v59  ;;  %853 = vmatmul.f32.gmra.mxu1 %v1722_v34 }
  0x87   : > { %548 = vmatmul.f32.gmra.mxu2 %v1739_v52 }
  0x88   : > { %768 = vmatmul.f32.gmra.mxu0 %v1722_v34 }
  0x8e   : > { %661 = vmatmul.f32.gmra.mxu3 %v317_v20  ;;  %857 = vmatmul.f32.gmra.mxu1 %v1746_v61 }
  0x8f   : > { %553 = vmatmul.f32.gmra.mxu2 %v316_v10 }
  0x90   : > { %772 = vmatmul.f32.gmra.mxu0 %v1746_v61 }
  0x96   : > { %667 = vmatmul.f32.gmra.mxu3 %v325_v46  ;;  %861 = vmatmul.f32.gmra.mxu1 %v323_v22  ;;  %v1918_v46 = vand.u32 127, %v897_v26 }
  0x97   : > { %558 = vmatmul.f32.gmra.mxu2 %v324_v30 }
  0x98   : > { %776 = vmatmul.f32.gmra.mxu0 %v323_v22  ;;  %vm899_vm1 = vcmp.lt.s32.totalorder %v1918_v46, 8  ;;  %vm900_vm3 = vcmp.ge.s32.totalorder %v1918_v46, 40  ;;  %vm901_vm4 = vcmp.lt.s32.totalorder %v1918_v46, 72 }
  0x99   : > { %vm2160_vm7 = vmand %vm900_vm3, %vm901_vm4 }
  0x9b   : > { %v1814_v32 = vpop.f32.mrf.mxu1 }
  0x9d   : > { %v1816_v38 = vpop.f32.mrf.mxu0 }
  0x9e   : > { %673 = vmatmul.f32.gmra.mxu3 %v333_v41  ;;  %865 = vmatmul.f32.gmra.mxu1 %v1602_v28  ;;  %v274_v20 = vadd.f32 %v1825_v40, %v1816_v38 }
  0x9f   : > { %563 = vmatmul.f32.gmra.mxu2 %v1613_v35 }
  0xa0   : > { %780 = vmatmul.f32.gmra.mxu0 %v1602_v28  ;;  %v435_v30 = vadd.f32 %v1814_v32, %v274_v20 }
  0xa1   : > { %v466_v44 = vpop.f32.mrf.mxu3 }
  0xa2   : > { %v337_v45 = vpop.f32.mrf.mxu2 }
  0xa3   : > { %v338_v50 = vadd.f32 %v1825_v40, %v337_v45  ;;  %v1829_v51 = vpop.f32.mrf.mxu1 }
  0xa5   : > { %v1831_v60 = vadd.f32 %v466_v44, %v338_v50  ;;  %v1833_v41 = vpop.f32.mrf.mxu0 }
  0xa6   : > { %679 = vmatmul.f32.gmra.mxu3 %v341_v47  ;;  %869 = vmatmul.f32.gmra.mxu1 %v1607_v31 }
  0xa7   : > { %568 = vmatmul.f32.gmra.mxu2 %v1617_v37 }
  0xa8   : > { %784 = vmatmul.f32.gmra.mxu0 %v1607_v31 }
  0xa9   : > { %v470_v28 = vpop.f32.mrf.mxu3 }
  0xaa   : > { %v345_v35 = vpop.f32.mrf.mxu2 }
  0xab   : > { %v346_v2 = vadd.f32 %v1825_v40, %v345_v35  ;;  %v1841_v3 = vpop.f32.mrf.mxu1 }
  0xad   : > { %v1843_v11 = vadd.f32 %v470_v28, %v346_v2  ;;  %v1845_v7 = vpop.f32.mrf.mxu0 }
  0xae   : > { %685 = vmatmul.f32.gmra.mxu3 %v349_v63  ;;  %873 = vmatmul.f32.gmra.mxu1 %v1635_v48 }
  0xaf   : > { %573 = vmatmul.f32.gmra.mxu2 %v1653_v57 }
  0xb0   : > { %788 = vmatmul.f32.gmra.mxu0 %v1635_v48 }
  0xb1   : > { %v474_v31 = vpop.f32.mrf.mxu3 }
  0xb2   : > { %v353_v37 = vpop.f32.mrf.mxu2 }
  0xb3   : > { %v354_v47 = vadd.f32 %v1825_v40, %v353_v37  ;;  %v1853_v17 = vpop.f32.mrf.mxu1 }
  0xb5   : > { %v1855_v24 = vadd.f32 %v474_v31, %v354_v47  ;;  %v1857_v33 = vpop.f32.mrf.mxu0 }
  0xb6   : > { %691 = vmatmul.f32.gmra.mxu3 %v357_v14  ;;  %877 = vmatmul.f32.gmra.mxu1 %v1667_v0 }
  0xb7   : > { %578 = vmatmul.f32.gmra.mxu2 %v1683_v9 }
  0xb8   : > { %792 = vmatmul.f32.gmra.mxu0 %v1667_v0 }
  0xb9   : > { %v478_v48 = vpop.f32.mrf.mxu3 }
  0xba   : > { %v361_v57 = vpop.f32.mrf.mxu2 }
  0xbb   : > { %v362_v63 = vadd.f32 %v1825_v40, %v361_v57  ;;  %v1865_v34 = vpop.f32.mrf.mxu1 }
  0xbd   : > { %v1867_v52 = vadd.f32 %v478_v48, %v362_v63  ;;  %v1869_v59 = vpop.f32.mrf.mxu0 }
  0xbe   : > { %697 = vmatmul.f32.gmra.mxu3 %v365_v27  ;;  %881 = vmatmul.f32.gmra.mxu1 %v1695_v15 }
  0xbf   : > { %583 = vmatmul.f32.gmra.mxu2 %v1708_v21 }
  0xc0   : > { %796 = vmatmul.f32.gmra.mxu0 %v1695_v15 }
  0xc1   : > { %v482_v0 = vpop.f32.mrf.mxu3 }
  0xc2   : > { %v369_v9 = vpop.f32.mrf.mxu2 }
  0xc3   : > { %v370_v14 = vadd.f32 %v1825_v40, %v369_v9  ;;  %v1877_v61 = vpop.f32.mrf.mxu1  ;;  %v298_v9 = vadd.f32 %v1825_v40, %v1857_v33 }
  0xc5   : > { %v1879_v62 = vadd.f32 %v482_v0, %v370_v14  ;;  %v1881_v1 = vpop.f32.mrf.mxu0 }
  0xc6   : > { %703 = vmatmul.f32.gmra.mxu3 %v373_v55  ;;  %885 = vmatmul.f32.gmra.mxu1 %v1719_v29 }
  0xc7   : > { %588 = vmatmul.f32.gmra.mxu2 %v1732_v43 }
  0xc8   : > { %800 = vmatmul.f32.gmra.mxu0 %v1719_v29 }
  0xc9   : > { %v486_v15 = vpop.f32.mrf.mxu3 }
  0xca   : > { %v377_v21 = vpop.f32.mrf.mxu2 }
  0xcb   : > { %v378_v27 = vadd.f32 %v1825_v40, %v377_v21  ;;  %v1889_v6 = vpop.f32.mrf.mxu1  ;;  %v447_v21 = vadd.f32 %v1853_v17, %v298_v9 }
  0xcd   : > { %v1891_v8 = vadd.f32 %v486_v15, %v378_v27  ;;  %v1893_v5 = vpop.f32.mrf.mxu0 }
  0xce   : > { %709 = vmatmul.f32.gmra.mxu3 %v381_v16  ;;  %889 = vmatmul.f32.gmra.mxu1 %v1743_v56 }
  0xcf   : > { %593 = vmatmul.f32.gmra.mxu2 %v1756_v4 }
  0xd0   : > { %804 = vmatmul.f32.gmra.mxu0 %v1743_v56 }
  0xd1   : > { %v490_v29 = vpop.f32.mrf.mxu3 }
  0xd2   : > { %v385_v43 = vpop.f32.mrf.mxu2 }
  0xd3   : > { %v386_v55 = vadd.f32 %v1825_v40, %v385_v43  ;;  %v1901_v10 = vpop.f32.mrf.mxu1 }
  0xd5   : > { %v1903_v12 = vadd.f32 %v490_v29, %v386_v55  ;;  %v1905_v13 = vpop.f32.mrf.mxu0 }
  0xd6   : > { %715 = vmatmul.f32.gmra.mxu3 %v389_v39  ;;  %893 = vmatmul.f32.gmra.mxu1 %v1765_v18 }
  0xd7   : > { %598 = vmatmul.f32.gmra.mxu2 %v1773_v25 }
  0xd8   : > { %808 = vmatmul.f32.gmra.mxu0 %v1765_v18  ;;  %v282_v18 = vadd.f32 %v1825_v40, %v1833_v41  ;;  %v290_v41 = vadd.f32 %v1825_v40, %v1845_v7 }
  0xd9   : > { %v494_v56 = vpop.f32.mrf.mxu3 }
  0xda   : > { %v393_v4 = vpop.f32.mrf.mxu2  ;;  %v439_v58 = vadd.f32 %v1829_v51, %v282_v18  ;;  %v443_v37 = vadd.f32 %v1841_v3, %v290_v41 }
  0xdb   : > { %v394_v16 = vadd.f32 %v1825_v40, %v393_v4  ;;  %v834_v19 = vpop.f32.mrf.mxu1  ;;  %v306_v4 = vadd.f32 %v1825_v40, %v1869_v59 }
  0xdd   : > { %v1915_v22 = vadd.f32 %v494_v56, %v394_v16  ;;  %v749_v23 = vpop.f32.mrf.mxu0  ;;  %v451_v20 = vadd.f32 %v1865_v34, %v306_v4 }
  0xe1   : > { %v626_v36 = vpop.f32.mrf.mxu3 }
  0xe2   : > { %v524_v39 = vpop.f32.mrf.mxu2 }
  0xe3   : > { %v525_v42 = vadd.f32 %v524_v39, %v435_v30  ;;  %v838_v25 = vpop.f32.mrf.mxu1 }
  0xe5   : > { %v627_v49 = vadd.f32 %v626_v36, %v525_v42  ;;  %v753_v53 = vpop.f32.mrf.mxu0  ;;  %v314_v42 = vadd.f32 %v1825_v40, %v1881_v1 }
  0xe7   : > { %v750_v54 = vadd.f32 %v749_v23, %v627_v49  ;;  %v455_v49 = vadd.f32 %v1877_v61, %v314_v42 }
  0xe9   : > { %v1924_v38 = vadd.f32 %v834_v19, %v750_v54  ;;  %v632_v44 = vpop.f32.mrf.mxu3 }
  0xea   : > { %v529_v32 = vpop.f32.mrf.mxu2 }
  0xeb   : > { %v530_v45 = vadd.f32 %v529_v32, %v439_v58  ;;  %v903_v50 = vsel %vm899_vm1, %v1924_v38, -inf  ;;  %v842_v28 = vpop.f32.mrf.mxu1 }
  0xec   : > { %919 = vmax.xlane.f32.xlu0 %v903_v50 }
  0xed   : > { %v633_v35 = vadd.f32 %v632_v44, %v530_v45  ;;  %v757_v2 = vpop.f32.mrf.mxu0  ;;  %v322_v45 = vadd.f32 %v1825_v40, %v1893_v5 }
  0xef   : > { %v754_v31 = vadd.f32 %v753_v53, %v633_v35  ;;  %v459_v41 = vadd.f32 %v1889_v6, %v322_v45 }
  0xf1   : > { %v1932_v51 = vadd.f32 %v838_v25, %v754_v31  ;;  %v638_v47 = vpop.f32.mrf.mxu3 }
  0xf2   : > { %v534_v48 = vpop.f32.mrf.mxu2 }
  0xf3   : > { %v535_v57 = vadd.f32 %v534_v48, %v443_v37  ;;  %v904_v63 = vsel %vm899_vm1, %v1932_v51, -inf  ;;  %v846_v0 = vpop.f32.mrf.mxu1  ;;  %v330_v48 = vadd.f32 %v1825_v40, %v1905_v13 }
  0xf4   : > { %921 = vmax.xlane.f32.xlu0 %v904_v63 }
  0xf5   : > { %v639_v7 = vadd.f32 %v638_v47, %v535_v57  ;;  %v761_v14 = vpop.f32.mrf.mxu0 }
  0xf7   : > { %v758_v15 = vadd.f32 %v757_v2, %v639_v7 }
  0xf9   : > { %v1940_v3 = vadd.f32 %v842_v28, %v758_v15  ;;  %v644_v27 = vpop.f32.mrf.mxu3 }
  0xfa   : > { %v539_v29 = vpop.f32.mrf.mxu2 }
  0xfb   : > { %v540_v43 = vadd.f32 %v539_v29, %v447_v21  ;;  %v905_v55 = vsel %vm899_vm1, %v1940_v3, -inf  ;;  %v850_v56 = vpop.f32.mrf.mxu1 }
  0xfc   : > { %923 = vmax.xlane.f32.xlu1 %v905_v55 }
  0xfd   : > { %v645_v33 = vadd.f32 %v644_v27, %v540_v43  ;;  %v765_v16 = vpop.f32.mrf.mxu0 }
  0xff   : > { %v762_v19 = vadd.f32 %v761_v14, %v645_v33 }
 0x101   : > { %v1948_v17 = vadd.f32 %v846_v0, %v762_v19  ;;  %v650_v23 = vpop.f32.mrf.mxu3  ;;  %v463_v0 = vadd.f32 %v1901_v10, %v330_v48 }
 0x102   : > { %v544_v26 = vpop.f32.mrf.mxu2 }
 0x103   : > { %v545_v30 = vadd.f32 %v544_v26, %v451_v20  ;;  %v906_v36 = vsel %vm899_vm1, %v1948_v17, -inf  ;;  %v854_v39 = vpop.f32.mrf.mxu1 }
 0x104   : > { %925 = vmax.xlane.f32.xlu1 %v906_v36 }
 0x105   : > { %v651_v59 = vadd.f32 %v650_v23, %v545_v30  ;;  %v769_v25 = vpop.f32.mrf.mxu0 }
 0x107   : > { %v766_v18 = vadd.f32 %v765_v16, %v651_v59 }
 0x109   : > { %v1956_v34 = vadd.f32 %v850_v56, %v766_v18  ;;  %v656_v53 = vpop.f32.mrf.mxu3 }
 0x10a   : > { %v549_v54 = vpop.f32.mrf.mxu2 }
 0x10b   : > { %v550_v58 = vadd.f32 %v549_v54, %v455_v49  ;;  %v907_v44 = vsel %vm899_vm1, %v1956_v34, -inf  ;;  %v858_v32 = vpop.f32.mrf.mxu1 }
 0x10c   : > { %927 = vmax.xlane.f32.xlu2 %v907_v44 }
 0x10d   : > { %v657_v1 = vadd.f32 %v656_v53, %v550_v58  ;;  %v773_v50 = vpop.f32.mrf.mxu0 }
 0x10f   : > { %v770_v28 = vadd.f32 %v769_v25, %v657_v1 }
 0x111   : > { %v1964_v61 = vadd.f32 %v854_v39, %v770_v28  ;;  %v662_v35 = vpop.f32.mrf.mxu3 }
 0x112   : > { %v554_v2 = vpop.f32.mrf.mxu2 }
 0x113   : > { %v555_v31 = vadd.f32 %v554_v2, %v459_v41  ;;  %v908_v37 = vsel %vm899_vm1, %v1964_v61, -inf  ;;  %v862_v47 = vpop.f32.mrf.mxu1 }
 0x114   : > { %929 = vmax.xlane.f32.xlu2 %v908_v37 }
 0x115   : > { %v663_v5 = vadd.f32 %v662_v35, %v555_v31  ;;  %v777_v57 = vpop.f32.mrf.mxu0 }
 0x117   : > { %v774_v63 = vadd.f32 %v773_v50, %v663_v5 }
 0x119   : > { %v1972_v6 = vadd.f32 %v858_v32, %v774_v63  ;;  %v668_v9 = vpop.f32.mrf.mxu3 }
 0x11a   : > { %v559_v7 = vpop.f32.mrf.mxu2 }
 0x11b   : > { %v560_v14 = vadd.f32 %v559_v7, %v463_v0  ;;  %v909_v15 = vsel %vm899_vm1, %v1972_v6, -inf  ;;  %v866_v21 = vpop.f32.mrf.mxu1 }
 0x11c   : > { %931 = vmax.xlane.f32.xlu0 %v909_v15 }
 0x11d   : > { %v669_v27 = vadd.f32 %v668_v9, %v560_v14  ;;  %v781_v29 = vpop.f32.mrf.mxu0 }
 0x11f   : > { %v778_v43 = vadd.f32 %v777_v57, %v669_v27 }
 0x121   : > { %v1977_v40 = vadd.f32 %v862_v47, %v778_v43  ;;  %v674_v13 = vpop.f32.mrf.mxu3 }
 0x122   : > { %v564_v55 = vpop.f32.mrf.mxu2 }
 0x123   : > { %v565_v10 = vadd.f32 %v564_v55, %v1831_v60  ;;  %v910_v56 = vsel %vm899_vm1, %v1977_v40, -inf  ;;  %v870_v4 = vpop.f32.mrf.mxu1 }
 0x124   : > { %933 = vmax.xlane.f32.xlu1 %v910_v56 }
 0x125   : > { %v675_v33 = vadd.f32 %v674_v13, %v565_v10  ;;  %v785_v16 = vpop.f32.mrf.mxu0 }
 0x127   : > { %v782_v19 = vadd.f32 %v781_v29, %v675_v33 }
 0x129   : > { %v1983_v20 = vadd.f32 %v866_v21, %v782_v19  ;;  %v680_v23 = vpop.f32.mrf.mxu3 }
 0x12a   : > { %v569_v26 = vpop.f32.mrf.mxu2 }
 0x12b   : > { %v570_v30 = vadd.f32 %v569_v26, %v1843_v11  ;;  %v911_v36 = vsel %vm899_vm1, %v1983_v20, -inf  ;;  %v874_v60 = vpop.f32.mrf.mxu1 }
 0x12c   : > { %935 = vmax.xlane.f32.xlu2 %v911_v36 }
 0x12d   : > { %v681_v39 = vadd.f32 %v680_v23, %v570_v30  ;;  %v789_v42 = vpop.f32.mrf.mxu0 }
 0x12f   : > { %v786_v59 = vadd.f32 %v785_v16, %v681_v39 }
 0x131   : > { %v1989_v25 = vadd.f32 %v870_v4, %v786_v59  ;;  %v686_v18 = vpop.f32.mrf.mxu3 }
 0x132   : > { %v574_v49 = vpop.f32.mrf.mxu2 }
 0x133   : > { %v575_v53 = vadd.f32 %v574_v49, %v1855_v24  ;;  %v912_v54 = vsel %vm899_vm1, %v1989_v25, -inf  ;;  %v878_v44 = vpop.f32.mrf.mxu1 }
 0x134   : > { %937 = vmax.xlane.f32.xlu0 %v912_v54 }
 0x135   : > { %v687_v11 = vadd.f32 %v686_v18, %v575_v53  ;;  %v793_v58 = vpop.f32.mrf.mxu0 }
 0x137   : > { %v790_v32 = vadd.f32 %v789_v42, %v687_v11 }
 0x139   : > { %v1995_v45 = vadd.f32 %v874_v60, %v790_v32  ;;  %v692_v1 = vpop.f32.mrf.mxu3 }
 0x13a   : > { %v579_v50 = vpop.f32.mrf.mxu2 }
 0x13b   : > { %v580_v28 = vadd.f32 %v579_v50, %v1867_v52  ;;  %v913_v41 = vsel %vm899_vm1, %v1995_v45, -inf  ;;  %v882_v31 = vpop.f32.mrf.mxu1 }
 0x13c   : > { %939 = vmax.xlane.f32.xlu1 %v913_v41 }
 0x13d   : > { %v693_v24 = vadd.f32 %v692_v1, %v580_v28  ;;  %v797_v35 = vpop.f32.mrf.mxu0 }
 0x13f   : > { %v794_v2 = vadd.f32 %v793_v58, %v693_v24 }
 0x141   : > { %v2001_v37 = vadd.f32 %v878_v44, %v794_v2  ;;  %v698_v47 = vpop.f32.mrf.mxu3 }
 0x142   : > { %v584_v48 = vpop.f32.mrf.mxu2 }
 0x143   : > { %v585_v5 = vadd.f32 %v584_v48, %v1879_v62  ;;  %v914_v57 = vsel %vm899_vm1, %v2001_v37, -inf  ;;  %v886_v15 = vpop.f32.mrf.mxu1 }
 0x144   : > { %941 = vmax.xlane.f32.xlu2 %v914_v57 }
 0x145   : > { %v699_v52 = vadd.f32 %v698_v47, %v585_v5  ;;  %v801_v0 = vpop.f32.mrf.mxu0 }
 0x147   : > { %v798_v63 = vadd.f32 %v797_v35, %v699_v52 }
 0x149   : > { %v2007_v9 = vadd.f32 %v882_v31, %v798_v63  ;;  %v704_v7 = vpop.f32.mrf.mxu3 }
 0x14a   : > { %v589_v14 = vpop.f32.mrf.mxu2 }
 0x14b   : > { %v590_v21 = vadd.f32 %v589_v14, %v1891_v8  ;;  %v915_v27 = vsel %vm899_vm1, %v2007_v9, -inf  ;;  %v890_v8 = vpop.f32.mrf.mxu1 }
 0x14c   : > { %943 = vmax.xlane.f32.xlu0 %v915_v27 }
 0x14d   : > { %v705_v62 = vadd.f32 %v704_v7, %v590_v21  ;;  %v805_v10 = vpop.f32.mrf.mxu0 }
 0x14f   : > { %v802_v29 = vadd.f32 %v801_v0, %v705_v62 }
 0x151   : > { %v2013_v43 = vadd.f32 %v886_v15, %v802_v29  ;;  %v710_v13 = vpop.f32.mrf.mxu3 }
 0x152   : > { %v594_v55 = vpop.f32.mrf.mxu2 }
 0x153   : > { %v595_v56 = vadd.f32 %v594_v55, %v1903_v12  ;;  %v916_v4 = vsel %vm899_vm1, %v2013_v43, -inf  ;;  %v894_v39 = vpop.f32.mrf.mxu1 }
 0x154   : > { %945 = vmax.xlane.f32.xlu1 %v916_v4 }
 0x155   : > { %v711_v33 = vadd.f32 %v710_v13, %v595_v56  ;;  %v809_v12 = vpop.f32.mrf.mxu0 }
 0x157   : > { %v806_v16 = vadd.f32 %v805_v10, %v711_v33 }
 0x159   : > { %v2019_v19 = vadd.f32 %v890_v8, %v806_v16  ;;  %v716_v26 = vpop.f32.mrf.mxu3 }
 0x15a   : > { %v599_v23 = vpop.f32.mrf.mxu2 }
 0x15b   : > { %v600_v30 = vadd.f32 %v599_v23, %v1915_v22  ;;  %v917_v36 = vsel %vm899_vm1, %v2019_v19, -inf }
 0x15c   : > { %947 = vmax.xlane.f32.xlu2 %v917_v36 }
 0x15d   : > { %v717_v60 = vadd.f32 %v716_v26, %v600_v30 }
 0x15f   : > { %v810_v42 = vadd.f32 %v809_v12, %v717_v60  ;;  %v920_v59 = vpop.xlane.xlu0 %919 }
 0x160   : > { %v951_v18 = vsel %vm899_vm1, %v920_v59, 0.0 }
 0x161   : > { %v967_v49 = vsub.f32 %v1924_v38, %v951_v18  ;;  %v2028_v53 = vadd.f32 %v894_v39, %v810_v42 }
 0x163   : > { %v983_v54 = vmul.f32 1.442695, %v967_v49  ;;  %v918_v22 = vsel %vm899_vm1, %v2028_v53, -inf }
 0x164   : > { %949 = vmax.xlane.f32.xlu0 %v918_v22 }
 0x165   : > { %1451 = vpow2.f32 %v983_v54 }
 0x167   : > { %v922_v11 = vpop.xlane.xlu0 %921 }
 0x168   : > { %v952_v58 = vsel %vm899_vm1, %v922_v11, 0.0 }
 0x169   : > { %v968_v44 = vsub.f32 %v1932_v51, %v952_v58 }
 0x16b   : > { %v2036_v32 = vpop.eup %1451  ;;  %v985_v1 = vmul.f32 1.442695, %v968_v44 }
 0x16c   : > { %v1015_v50 = vsel %vm899_vm1, %v2036_v32, 0.0 }
 0x16d   : > { %1453 = vpow2.f32 %v985_v1  ;;  %1031 = vadd.xlane.f32.xlu1 %v1015_v50 }
 0x16f   : > { %v924_v28 = vpop.xlane.xlu1 %923 }
 0x170   : > { %v953_v41 = vsel %vm899_vm1, %v924_v28, 0.0 }
 0x171   : > { %v969_v24 = vsub.f32 %v1940_v3, %v953_v41 }
 0x173   : > { %v2044_v35 = vpop.eup %1453  ;;  %v987_v2 = vmul.f32 1.442695, %v969_v24 }
 0x174   : > { %v1016_v31 = vsel %vm899_vm1, %v2044_v35, 0.0 }
 0x175   : > { %1455 = vpow2.f32 %v987_v2  ;;  %1033 = vadd.xlane.f32.xlu2 %v1016_v31 }
 0x177   : > { %v926_v47 = vpop.xlane.xlu1 %925 }
 0x178   : > { %v954_v48 = vsel %vm899_vm1, %v926_v47, 0.0 }
 0x179   : > { %v970_v5 = vsub.f32 %v1948_v17, %v954_v48 }
 0x17b   : > { %v2052_v57 = vpop.eup %1455  ;;  %v989_v52 = vmul.f32 1.442695, %v970_v5 }
 0x17c   : > { %v1017_v63 = vsel %vm899_vm1, %v2052_v57, 0.0 }
 0x17d   : > { %1457 = vpow2.f32 %v989_v52  ;;  %1035 = vadd.xlane.f32.xlu0 %v1017_v63 }
 0x17f   : > { %v928_v0 = vpop.xlane.xlu2 %927 }
 0x180   : > { %v955_v7 = vsel %vm899_vm1, %v928_v0, 0.0 }
 0x181   : > { %v971_v14 = vsub.f32 %v1956_v34, %v955_v7 }
 0x183   : > { %v2060_v15 = vpop.eup %1457  ;;  %v991_v21 = vmul.f32 1.442695, %v971_v14 }
 0x184   : > { %v1018_v27 = vsel %vm899_vm1, %v2060_v15, 0.0 }
 0x185   : > { %1459 = vpow2.f32 %v991_v21  ;;  %1037 = vadd.xlane.f32.xlu1 %v1018_v27 }
 0x187   : > { %v930_v62 = vpop.xlane.xlu2 %929 }
 0x188   : > { %v956_v29 = vsel %vm899_vm1, %v930_v62, 0.0 }
 0x189   : > { %v972_v13 = vsub.f32 %v1964_v61, %v956_v29 }
 0x18b   : > { %v2068_v55 = vpop.eup %1459  ;;  %v993_v10 = vmul.f32 1.442695, %v972_v13 }
 0x18c   : > { %v1019_v56 = vsel %vm899_vm1, %v2068_v55, 0.0 }
 0x18d   : > { %1461 = vpow2.f32 %v993_v10  ;;  %1039 = vadd.xlane.f32.xlu2 %v1019_v56 }
 0x18f   : > { %v932_v4 = vpop.xlane.xlu0 %931 }
 0x190   : > { %v957_v8 = vsel %vm899_vm1, %v932_v4, 0.0 }
 0x191   : > { %v973_v33 = vsub.f32 %v1972_v6, %v957_v8 }
 0x193   : > { %v2076_v16 = vpop.eup %1461  ;;  %v995_v23 = vmul.f32 1.442695, %v973_v33 }
 0x194   : > { %v1020_v26 = vsel %vm899_vm1, %v2076_v16, 0.0 }
 0x195   : > { %1463 = vpow2.f32 %v995_v23  ;;  %1041 = vadd.xlane.f32.xlu0 %v1020_v26 }
 0x197   : > { %v934_v30 = vpop.xlane.xlu1 %933 }
 0x198   : > { %v958_v36 = vsel %vm899_vm1, %v934_v30, 0.0 }
 0x199   : > { %v974_v12 = vsub.f32 %v1977_v40, %v958_v36 }
 0x19b   : > { %v2084_v60 = vpop.eup %1463  ;;  %v997_v39 = vmul.f32 1.442695, %v974_v12 }
 0x19c   : > { %v1021_v42 = vsel %vm899_vm1, %v2084_v60, 0.0 }
 0x19d   : > { %1465 = vpow2.f32 %v997_v39  ;;  %1043 = vadd.xlane.f32.xlu1 %v1021_v42 }
 0x19f   : > { %v936_v59 = vpop.xlane.xlu2 %935 }
 0x1a0   : > { %v959_v18 = vsel %vm899_vm1, %v936_v59, 0.0 }
 0x1a1   : > { %v975_v49 = vsub.f32 %v1983_v20, %v959_v18 }
 0x1a3   : > { %v2092_v54 = vpop.eup %1465  ;;  %v999_v22 = vmul.f32 1.442695, %v975_v49 }
 0x1a4   : > { %v1022_v11 = vsel %vm899_vm1, %v2092_v54, 0.0 }
 0x1a5   : > { %1467 = vpow2.f32 %v999_v22  ;;  %1045 = vadd.xlane.f32.xlu2 %v1022_v11 }
 0x1a7   : > { %v938_v58 = vpop.xlane.xlu0 %937 }
 0x1a8   : > { %v960_v44 = vsel %vm899_vm1, %v938_v58, 0.0 }
 0x1a9   : > { %v976_v1 = vsub.f32 %v1989_v25, %v960_v44 }
 0x1ab   : > { %v2100_v50 = vpop.eup %1467  ;;  %v1001_v28 = vmul.f32 1.442695, %v976_v1 }
 0x1ac   : > { %v1023_v41 = vsel %vm899_vm1, %v2100_v50, 0.0 }
 0x1ad   : > { %1469 = vpow2.f32 %v1001_v28  ;;  %1047 = vadd.xlane.f32.xlu0 %v1023_v41 }
 0x1af   : > { %v940_v24 = vpop.xlane.xlu1 %939 }
 0x1b0   : > { %v961_v2 = vsel %vm899_vm1, %v940_v24, 0.0 }
 0x1b1   : > { %v977_v31 = vsub.f32 %v1995_v45, %v961_v2 }
 0x1b3   : > { %v2108_v47 = vpop.eup %1469  ;;  %v1003_v48 = vmul.f32 1.442695, %v977_v31 }
 0x1b4   : > { %v1024_v5 = vsel %vm899_vm1, %v2108_v47, 0.0 }
 0x1b5   : > { %1471 = vpow2.f32 %v1003_v48  ;;  %1049 = vadd.xlane.f32.xlu1 %v1024_v5 }
 0x1b7   : > { %v942_v52 = vpop.xlane.xlu2 %941 }
 0x1b8   : > { %v962_v63 = vsel %vm899_vm1, %v942_v52, 0.0 }
 0x1b9   : > { %v978_v0 = vsub.f32 %v2001_v37, %v962_v63 }
 0x1bb   : > { %v2116_v7 = vpop.eup %1471  ;;  %v1005_v14 = vmul.f32 1.442695, %v978_v0 }
 0x1bc   : > { %v1025_v21 = vsel %vm899_vm1, %v2116_v7, 0.0 }
 0x1bd   : > { %1473 = vpow2.f32 %v1005_v14  ;;  %1051 = vadd.xlane.f32.xlu2 %v1025_v21 }
 0x1bf   : > { %v944_v27 = vpop.xlane.xlu0 %943 }
 0x1c0   : > { %v963_v62 = vsel %vm899_vm1, %v944_v27, 0.0 }
 0x1c1   : > { %v979_v29 = vsub.f32 %v2007_v9, %v963_v62 }
 0x1c3   : > { %v2124_v13 = vpop.eup %1473  ;;  %v1007_v10 = vmul.f32 1.442695, %v979_v29 }
 0x1c4   : > { %v1026_v56 = vsel %vm899_vm1, %v2124_v13, 0.0 }
 0x1c5   : > { %1475 = vpow2.f32 %v1007_v10  ;;  %1053 = vadd.xlane.f32.xlu0 %v1026_v56 }
 0x1c7   : > { %v946_v4 = vpop.xlane.xlu1 %945 }
 0x1c8   : > { %v964_v8 = vsel %vm899_vm1, %v946_v4, 0.0 }
 0x1c9   : > { %v980_v33 = vsub.f32 %v2013_v43, %v964_v8 }
 0x1cb   : > { %v2132_v23 = vpop.eup %1475  ;;  %v1009_v26 = vmul.f32 1.442695, %v980_v33 }
 0x1cc   : > { %v1027_v30 = vsel %vm899_vm1, %v2132_v23, 0.0 }
 0x1cd   : > { %1477 = vpow2.f32 %v1009_v26  ;;  %1055 = vadd.xlane.f32.xlu1 %v1027_v30  ;;  %v1319_v26 = vsel %vm2160_vm7, %v2036_v32, %v1924_v38 }
 0x1cf   : > { %v948_v36 = vpop.xlane.xlu2 %947 }
 0x1d0   : > { %v965_v12 = vsel %vm899_vm1, %v948_v36, 0.0 }
 0x1d1   : > { %v981_v39 = vsub.f32 %v2019_v19, %v965_v12 }
 0x1d3   : > { %v2140_v42 = vpop.eup %1477  ;;  %v1011_v59 = vmul.f32 1.442695, %v981_v39 }
 0x1d4   : > { %v1028_v18 = vsel %vm899_vm1, %v2140_v42, 0.0 }
 0x1d5   : > { %1479 = vpow2.f32 %v1011_v59  ;;  %1057 = vadd.xlane.f32.xlu2 %v1028_v18 }
 0x1d7   : > { %v950_v49 = vpop.xlane.xlu0 %949 }
 0x1d8   : > { %v966_v22 = vsel %vm899_vm1, %v950_v49, 0.0 }
 0x1d9   : > { %v982_v11 = vsub.f32 %v2028_v53, %v966_v22 }
 0x1db   : > { %v2148_v58 = vpop.eup %1479  ;;  %v1013_v44 = vmul.f32 1.442695, %v982_v11 }
 0x1dc   : > { %v1029_v1 = vsel %vm899_vm1, %v2148_v58, 0.0 }
 0x1dd   : > { %1481 = vpow2.f32 %v1013_v44  ;;  %1059 = vadd.xlane.f32.xlu0 %v1029_v1 }
 0x1e0   : > { %v1032_v28 = vpop.xlane.xlu1 %1031 }
 0x1e1   : > { %1483 = vrcp.f32 %v1032_v28  ;;  %v1074_v52 = vand.u32 2147483648, %v1032_v28  ;;  %v1072_v0 = vand.u32 2147483647, %v1032_v28  ;;  %vm1068_vm5 = vweird.f32 %v1032_v28 }
 0x1e3   : > { %v2153_v41 = vpop.eup %1481  ;;  %v1075_v27 = vor.u32 1.1754944e-38, %v1074_v52  ;;  %vm1073_vm8 = vcmp.eq.f32.partialorder %v1072_v0, 8.507059e+37 }
 0x1e4   : > { %v1030_v24 = vsel %vm899_vm1, %v2153_v41, 0.0 }
 0x1e5   : > { %1061 = vadd.xlane.f32.xlu1 %v1030_v24 }
 0x1e7   : > { %v1484_v2 = vpop.eup %1483 }
 0x1e8   : > { %v1064_v31 = vmul.f32 %v1484_v2, %v1032_v28  ;;  %v1034_v48 = vpop.xlane.xlu2 %1033  ;;  %vm1069_vm2 = vweird.f32 %v1484_v2  ;;  %v1320_v28 = vsel %vm2160_vm7, %v2044_v35, %v1932_v51 }
 0x1e9   : > { %1485 = vrcp.f32 %v1034_v48  ;;  %vm1070_vm6 = vmor %vm1068_vm5, %vm1069_vm2  ;;  %v1089_v30 = vand.u32 2147483648, %v1034_v48  ;;  %v1087_v39 = vand.u32 2147483647, %v1034_v48  ;;  %vm1083_vm10 = vweird.f32 %v1034_v48 }
 0x1ea   : > { %v1065_v5 = vsub.f32 1.0, %v1064_v31 }
 0x1eb   : > { %v1090_v49 = vor.u32 1.1754944e-38, %v1089_v30  ;;  %vm1088_vm12 = vcmp.eq.f32.partialorder %v1087_v39, 8.507059e+37 }
 0x1ec   : > { %v1066_v63 = vmul.f32 %v1484_v2, %v1065_v5 }
 0x1ee   : > { %v1067_v14 = vadd.f32 %v1484_v2, %v1066_v63 }
 0x1ef   : > { %v1486_v21 = vpop.eup %1485 }
 0x1f0   : > { %v1071_v29 = vsel %vm1070_vm6, %v1484_v2, %v1067_v14  ;;  %v1079_v10 = vmul.f32 %v1486_v21, %v1034_v48  ;;  %v1036_v56 = vpop.xlane.xlu0 %1035  ;;  %vm1084_vm9 = vweird.f32 %v1486_v21 }
 0x1f1   : > { %v1076_v4 = vsel %vm1073_vm8, %v1075_v27, %v1071_v29  ;;  %1487 = vrcp.f32 %v1036_v56  ;;  %vm1085_vm11 = vmor %vm1083_vm10, %vm1084_vm9  ;;  %v1104_v24 = vand.u32 2147483648, %v1036_v56  ;;  %v1102_v48 = vand.u32 2147483647, %v1036_v56 }
 0x1f2   : > { %v1303_v8 = vmul.f32 %v2036_v32, %v1076_v4  ;;  %v1080_v33 = vsub.f32 1.0, %v1079_v10  ;;  %vm1098_vm14 = vweird.f32 %v1036_v56  ;;  %v1321_v29 = vsel %vm2160_vm7, %v2052_v57, %v1940_v3 }
 0x1f3   : > { %v1105_v63 = vor.u32 1.1754944e-38, %v1104_v24  ;;  %vm1103_vm0 = vcmp.eq.f32.partialorder %v1102_v48, 8.507059e+37  ;;  %v1323_v48 = vsel %vm2160_vm7, %v2068_v55, %v1956_v34 }
 0x1f4   : > { %v1335_v36 = vsel %vm899_vm1, %v1303_v8, %v1319_v26  ;;  %v1081_v12 = vmul.f32 %v1486_v21, %v1080_v33 }
 0x1f5   : > { %1351 = vst [vmem:[%s2169_s4] sm:$0xff] %v1335_v36 }
 0x1f6   : > { %v1082_v59 = vadd.f32 %v1486_v21, %v1081_v12 }
 0x1f7   : > { %v1488_v18 = vpop.eup %1487 }
 0x1f8   : > { %v1086_v22 = vsel %vm1085_vm11, %v1486_v21, %v1082_v59  ;;  %v1094_v11 = vmul.f32 %v1488_v18, %v1036_v56  ;;  %v1038_v44 = vpop.xlane.xlu1 %1037  ;;  %vm1099_vm13 = vweird.f32 %v1488_v18 }
 0x1f9   : > { %v1091_v1 = vsel %vm1088_vm12, %v1090_v49, %v1086_v22  ;;  %1489 = vrcp.f32 %v1038_v44  ;;  %vm1100_vm15 = vmor %vm1098_vm14, %vm1099_vm13  ;;  %v1119_v10 = vand.u32 2147483648, %v1038_v44  ;;  %v1117_v8 = vand.u32 2147483647, %v1038_v44 }
 0x1fa   : > { %v1304_v38 = vmul.f32 %v2044_v35, %v1091_v1  ;;  %v1095_v32 = vsub.f32 1.0, %v1094_v11  ;;  %vm1113_vm3 = vweird.f32 %v1038_v44 }
 0x1fb   : > { %v1120_v30 = vor.u32 1.1754944e-38, %v1119_v10  ;;  %vm1118_vm5 = vcmp.eq.f32.partialorder %v1117_v8, 8.507059e+37 }
 0x1fc   : > { %v1336_v2 = vsel %vm899_vm1, %v1304_v38, %v1320_v28  ;;  %v1096_v31 = vmul.f32 %v1488_v18, %v1095_v32 }
 0x1fd   : > { %1352 = vst [vmem:[%s2169_s4 + $0x8] sm:$0xff] %v1336_v2 }
 0x1fe   : > { %v1097_v5 = vadd.f32 %v1488_v18, %v1096_v31 }
 0x1ff   : > { %v1490_v52 = vpop.eup %1489 }
 0x200   : > { %v1101_v0 = vsel %vm1100_vm15, %v1488_v18, %v1097_v5  ;;  %v1109_v14 = vmul.f32 %v1490_v52, %v1038_v44  ;;  %v1040_v21 = vpop.xlane.xlu2 %1039  ;;  %vm1114_vm2 = vweird.f32 %v1490_v52  ;;  %v1322_v18 = vsel %vm2160_vm7, %v2060_v15, %v1948_v17 }
 0x201   : > { %v1106_v27 = vsel %vm1103_vm0, %v1105_v63, %v1101_v0  ;;  %1491 = vrcp.f32 %v1040_v21  ;;  %vm1115_vm4 = vmor %vm1113_vm3, %vm1114_vm2  ;;  %v1134_v49 = vand.u32 2147483648, %v1040_v21  ;;  %v1132_v44 = vand.u32 2147483647, %v1040_v21 }
 0x202   : > { %v1305_v51 = vmul.f32 %v2052_v57, %v1106_v27  ;;  %v1110_v35 = vsub.f32 1.0, %v1109_v14  ;;  %vm1128_vm8 = vweird.f32 %v1040_v21 }
 0x203   : > { %v1135_v32 = vor.u32 1.1754944e-38, %v1134_v49  ;;  %vm1133_vm10 = vcmp.eq.f32.partialorder %v1132_v44, 8.507059e+37 }
 0x204   : > { %v1337_v56 = vsel %vm899_vm1, %v1305_v51, %v1321_v29  ;;  %v1111_v4 = vmul.f32 %v1490_v52, %v1110_v35 }
 0x205   : > { %1353 = vst [vmem:[%s2169_s4 + $0x10] sm:$0xff] %v1337_v56  ;;  %v1324_v56 = vsel %vm2160_vm7, %v2076_v16, %v1964_v61 }
 0x206   : > { %v1112_v33 = vadd.f32 %v1490_v52, %v1111_v4 }
 0x207   : > { %v1492_v26 = vpop.eup %1491 }
 0x208   : > { %v1116_v36 = vsel %vm1115_vm4, %v1490_v52, %v1112_v33  ;;  %v1124_v12 = vmul.f32 %v1492_v26, %v1040_v21  ;;  %v1042_v39 = vpop.xlane.xlu0 %1041  ;;  %vm1129_vm6 = vweird.f32 %v1492_v26 }
 0x209   : > { %v1121_v59 = vsel %vm1118_vm5, %v1120_v30, %v1116_v36  ;;  %1493 = vrcp.f32 %v1042_v39  ;;  %vm1130_vm9 = vmor %vm1128_vm8, %vm1129_vm6  ;;  %v1149_v5 = vand.u32 2147483648, %v1042_v39  ;;  %v1147_v0 = vand.u32 2147483647, %v1042_v39 }
 0x20a   : > { %v1306_v3 = vmul.f32 %v2060_v15, %v1121_v59  ;;  %v1125_v57 = vsub.f32 1.0, %v1124_v12  ;;  %vm1143_vm12 = vweird.f32 %v1042_v39 }
 0x20b   : > { %v1150_v27 = vor.u32 1.1754944e-38, %v1149_v5  ;;  %vm1148_vm14 = vcmp.eq.f32.partialorder %v1147_v0, 8.507059e+37 }
 0x20c   : > { %v1338_v22 = vsel %vm899_vm1, %v1306_v3, %v1322_v18  ;;  %v1126_v11 = vmul.f32 %v1492_v26, %v1125_v57  ;;  %v1325_v18 = vsel %vm2160_vm7, %v2084_v60, %v1972_v6 }
 0x20d   : > { %1354 = vst [vmem:[%s2169_s4 + $0x18] sm:$0xff] %v1338_v22 }
 0x20e   : > { %v1127_v1 = vadd.f32 %v1492_v26, %v1126_v11 }
 0x20f   : > { %v1494_v38 = vpop.eup %1493 }
 0x210   : > { %v1131_v28 = vsel %vm1130_vm9, %v1492_v26, %v1127_v1  ;;  %v1139_v24 = vmul.f32 %v1494_v38, %v1042_v39  ;;  %v1044_v2 = vpop.xlane.xlu1 %1043  ;;  %vm1144_vm11 = vweird.f32 %v1494_v38 }
 0x211   : > { %v1136_v31 = vsel %vm1133_vm10, %v1135_v32, %v1131_v28  ;;  %1495 = vrcp.f32 %v1044_v2  ;;  %vm1145_vm13 = vmor %vm1143_vm12, %vm1144_vm11  ;;  %v1164_v4 = vand.u32 2147483648, %v1044_v2  ;;  %v1162_v26 = vand.u32 2147483647, %v1044_v2 }
 0x212   : > { %v1307_v17 = vmul.f32 %v2068_v55, %v1136_v31  ;;  %v1140_v15 = vsub.f32 1.0, %v1139_v24  ;;  %vm1158_vm0 = vweird.f32 %v1044_v2 }
 0x213   : > { %v1165_v12 = vor.u32 1.1754944e-38, %v1164_v4  ;;  %vm1163_vm3 = vcmp.eq.f32.partialorder %v1162_v26, 8.507059e+37 }
 0x214   : > { %v1339_v52 = vsel %vm899_vm1, %v1307_v17, %v1323_v48  ;;  %v1141_v63 = vmul.f32 %v1494_v38, %v1140_v15  ;;  %v1326_v17 = vsel %vm2160_vm7, %v2092_v54, %v1977_v40 }
 0x215   : > { %1355 = vst [vmem:[%s2169_s4 + $0x20] sm:$0xff] %v1339_v52 }
 0x216   : > { %v1142_v14 = vadd.f32 %v1494_v38, %v1141_v63 }
 0x217   : > { %v1496_v21 = vpop.eup %1495 }
 0x218   : > { %v1146_v51 = vsel %vm1145_vm13, %v1494_v38, %v1142_v14  ;;  %v1154_v35 = vmul.f32 %v1496_v21, %v1044_v2  ;;  %v1046_v29 = vpop.xlane.xlu2 %1045  ;;  %vm1159_vm15 = vweird.f32 %v1496_v21 }
 0x219   : > { %v1151_v10 = vsel %vm1148_vm14, %v1150_v27, %v1146_v51  ;;  %1497 = vrcp.f32 %v1046_v29  ;;  %vm1160_vm2 = vmor %vm1158_vm0, %vm1159_vm15  ;;  %v1179_v49 = vand.u32 2147483648, %v1046_v29  ;;  %v1177_v44 = vand.u32 2147483647, %v1046_v29 }
 0x21a   : > { %v1308_v34 = vmul.f32 %v2076_v16, %v1151_v10  ;;  %v1155_v55 = vsub.f32 1.0, %v1154_v35  ;;  %vm1173_vm5 = vweird.f32 %v1046_v29 }
 0x21b   : > { %v1180_v32 = vor.u32 1.1754944e-38, %v1179_v49  ;;  %vm1178_vm8 = vcmp.eq.f32.partialorder %v1177_v44, 8.507059e+37 }
 0x21c   : > { %v1340_v8 = vsel %vm899_vm1, %v1308_v34, %v1324_v56  ;;  %v1156_v33 = vmul.f32 %v1496_v21, %v1155_v55 }
 0x21d   : > { %1356 = vst [vmem:[%s2169_s4 + $0x28] sm:$0xff] %v1340_v8 }
 0x21e   : > { %v1157_v30 = vadd.f32 %v1496_v21, %v1156_v33 }
 0x21f   : > { %v1498_v36 = vpop.eup %1497 }
 0x220   : > { %v1161_v39 = vsel %vm1160_vm2, %v1496_v21, %v1157_v30  ;;  %v1169_v59 = vmul.f32 %v1498_v36, %v1046_v29  ;;  %v1048_v3 = vpop.xlane.xlu0 %1047  ;;  %vm1174_vm4 = vweird.f32 %v1498_v36  ;;  %v1327_v29 = vsel %vm2160_vm7, %v2100_v50, %v1983_v20 }
 0x221   : > { %v1166_v57 = vsel %vm1163_vm3, %v1165_v12, %v1161_v39  ;;  %1499 = vrcp.f32 %v1048_v3  ;;  %vm1175_vm6 = vmor %vm1173_vm5, %vm1174_vm4  ;;  %v1194_v15 = vand.u32 2147483648, %v1048_v3  ;;  %v1192_v52 = vand.u32 2147483647, %v1048_v3 }
 0x222   : > { %v1309_v61 = vmul.f32 %v2084_v60, %v1166_v57  ;;  %v1170_v16 = vsub.f32 1.0, %v1169_v59  ;;  %vm1188_vm10 = vweird.f32 %v1048_v3  ;;  %v1328_v39 = vsel %vm2160_vm7, %v2108_v47, %v1989_v25 }
 0x223   : > { %v1195_v14 = vor.u32 1.1754944e-38, %v1194_v15  ;;  %vm1193_vm12 = vcmp.eq.f32.partialorder %v1192_v52, 8.507059e+37  ;;  %v1330_v52 = vsel %vm2160_vm7, %v2124_v13, %v2001_v37 }
 0x224   : > { %v1341_v22 = vsel %vm899_vm1, %v1309_v61, %v1325_v18  ;;  %v1171_v11 = vmul.f32 %v1498_v36, %v1170_v16 }
 0x225   : > { %1357 = vst [vmem:[%s2169_s4 + $0x30] sm:$0xff] %v1341_v22 }
 0x226   : > { %v1172_v1 = vadd.f32 %v1498_v36, %v1171_v11 }
 0x227   : > { %v1500_v38 = vpop.eup %1499 }
 0x228   : > { %v1176_v28 = vsel %vm1175_vm6, %v1498_v36, %v1172_v1  ;;  %v1184_v24 = vmul.f32 %v1500_v38, %v1048_v3  ;;  %v1050_v2 = vpop.xlane.xlu1 %1049  ;;  %vm1189_vm9 = vweird.f32 %v1500_v38 }
 0x229   : > { %v1181_v31 = vsel %vm1178_vm8, %v1180_v32, %v1176_v28  ;;  %1501 = vrcp.f32 %v1050_v2  ;;  %vm1190_vm11 = vmor %vm1188_vm10, %vm1189_vm9  ;;  %v1209_v10 = vand.u32 2147483648, %v1050_v2  ;;  %v1207_v56 = vand.u32 2147483647, %v1050_v2 }
 0x22a   : > { %v1310_v6 = vmul.f32 %v2092_v54, %v1181_v31  ;;  %v1185_v60 = vsub.f32 1.0, %v1184_v24  ;;  %vm1203_vm14 = vweird.f32 %v1050_v2 }
 0x22b   : > { %v1210_v33 = vor.u32 1.1754944e-38, %v1209_v10  ;;  %vm1208_vm0 = vcmp.eq.f32.partialorder %v1207_v56, 8.507059e+37 }
 0x22c   : > { %v1342_v48 = vsel %vm899_vm1, %v1310_v6, %v1326_v17  ;;  %v1186_v5 = vmul.f32 %v1500_v38, %v1185_v60 }
 0x22d   : > { %1358 = vst [vmem:[%s2169_s4 + $0x38] sm:$0xff] %v1342_v48 }
 0x22e   : > { %v1187_v63 = vadd.f32 %v1500_v38, %v1186_v5 }
 0x22f   : > { %v1502_v0 = vpop.eup %1501 }
 0x230   : > { %v1191_v21 = vsel %vm1190_vm11, %v1500_v38, %v1187_v63  ;;  %v1199_v27 = vmul.f32 %v1502_v0, %v1050_v2  ;;  %v1052_v51 = vpop.xlane.xlu2 %1051  ;;  %vm1204_vm13 = vweird.f32 %v1502_v0  ;;  %v1329_v38 = vsel %vm2160_vm7, %v2116_v7, %v1995_v45 }
 0x231   : > { %v1196_v35 = vsel %vm1193_vm12, %v1195_v14, %v1191_v21  ;;  %1503 = vrcp.f32 %v1052_v51  ;;  %vm1205_vm15 = vmor %vm1203_vm14, %vm1204_vm13  ;;  %v1224_v59 = vand.u32 2147483648, %v1052_v51  ;;  %v1222_v61 = vand.u32 2147483647, %v1052_v51 }
 0x232   : > { %v1311_v40 = vmul.f32 %v2100_v50, %v1196_v35  ;;  %v1200_v54 = vsub.f32 1.0, %v1199_v27  ;;  %vm1218_vm3 = vweird.f32 %v1052_v51 }
 0x233   : > { %v1225_v49 = vor.u32 1.1754944e-38, %v1224_v59  ;;  %vm1223_vm5 = vcmp.eq.f32.partialorder %v1222_v61, 8.507059e+37 }
 0x234   : > { %v1343_v34 = vsel %vm899_vm1, %v1311_v40, %v1327_v29  ;;  %v1201_v55 = vmul.f32 %v1502_v0, %v1200_v54 }
 0x235   : > { %1359 = vst [vmem:[%s2169_s4 + $0x40] sm:$0xff] %v1343_v34  ;;  %v1331_v34 = vsel %vm2160_vm7, %v2132_v23, %v2007_v9 }
 0x236   : > { %v1202_v4 = vadd.f32 %v1502_v0, %v1201_v55 }
 0x237   : > { %v1504_v8 = vpop.eup %1503 }
 0x238   : > { %v1206_v26 = vsel %vm1205_vm15, %v1502_v0, %v1202_v4  ;;  %v1214_v30 = vmul.f32 %v1504_v8, %v1052_v51  ;;  %v1054_v36 = vpop.xlane.xlu0 %1053  ;;  %vm1219_vm2 = vweird.f32 %v1504_v8 }
 0x239   : > { %v1211_v12 = vsel %vm1208_vm0, %v1210_v33, %v1206_v26  ;;  %1505 = vrcp.f32 %v1054_v36  ;;  %vm1220_vm4 = vmor %vm1218_vm3, %vm1219_vm2  ;;  %v1239_v32 = vand.u32 2147483648, %v1054_v36  ;;  %v1237_v2 = vand.u32 2147483647, %v1054_v36 }
 0x23a   : > { %v1312_v20 = vmul.f32 %v2108_v47, %v1211_v12  ;;  %v1215_v50 = vsub.f32 1.0, %v1214_v30  ;;  %vm1233_vm8 = vweird.f32 %v1054_v36 }
 0x23b   : > { %v1240_v60 = vor.u32 1.1754944e-38, %v1239_v32  ;;  %vm1238_vm10 = vcmp.eq.f32.partialorder %v1237_v2, 8.507059e+37 }
 0x23c   : > { %v1344_v3 = vsel %vm899_vm1, %v1312_v20, %v1328_v39  ;;  %v1216_v57 = vmul.f32 %v1504_v8, %v1215_v50  ;;  %v1332_v39 = vsel %vm2160_vm7, %v2140_v42, %v2013_v43 }
 0x23d   : > { %1360 = vst [vmem:[%s2169_s4 + $0x48] sm:$0xff] %v1344_v3 }
 0x23e   : > { %v1217_v16 = vadd.f32 %v1504_v8, %v1216_v57 }
 0x23f   : > { %v1506_v18 = vpop.eup %1505 }
 0x240   : > { %v1221_v22 = vsel %vm1220_vm4, %v1504_v8, %v1217_v16  ;;  %v1229_v11 = vmul.f32 %v1506_v18, %v1054_v36  ;;  %v1056_v44 = vpop.xlane.xlu1 %1055  ;;  %vm1234_vm6 = vweird.f32 %v1506_v18 }
 0x241   : > { %v1226_v1 = vsel %vm1223_vm5, %v1225_v49, %v1221_v22  ;;  %1507 = vrcp.f32 %v1056_v44  ;;  %vm1235_vm9 = vmor %vm1233_vm8, %vm1234_vm6  ;;  %v1254_v63 = vand.u32 2147483648, %v1056_v44  ;;  %v1252_v21 = vand.u32 2147483647, %v1056_v44 }
 0x242   : > { %v1313_v25 = vmul.f32 %v2116_v7, %v1226_v1  ;;  %v1230_v47 = vsub.f32 1.0, %v1229_v11  ;;  %vm1248_vm12 = vweird.f32 %v1056_v44  ;;  %v1333_v1 = vsel %vm2160_vm7, %v2148_v58, %v2019_v19 }
 0x243   : > { %v1255_v35 = vor.u32 1.1754944e-38, %v1254_v63  ;;  %vm1253_vm14 = vcmp.eq.f32.partialorder %v1252_v21, 8.507059e+37  ;;  %v1334_v19 = vsel %vm2160_vm7, %v2153_v41, %v2028_v53 }
 0x244   : > { %v1345_v28 = vsel %vm899_vm1, %v1313_v25, %v1329_v38  ;;  %v1231_v24 = vmul.f32 %v1506_v18, %v1230_v47 }
 0x245   : > { %1361 = vst [vmem:[%s2169_s4 + $0x50] sm:$0xff] %v1345_v28 }
 0x246   : > { %v1232_v31 = vadd.f32 %v1506_v18, %v1231_v24 }
 0x247   : > { %v1508_v6 = vpop.eup %1507 }
 0x248   : > { %v1236_v17 = vsel %vm1235_vm9, %v1506_v18, %v1232_v31  ;;  %v1244_v15 = vmul.f32 %v1508_v6, %v1056_v44  ;;  %v1058_v48 = vpop.xlane.xlu2 %1057  ;;  %vm1249_vm11 = vweird.f32 %v1508_v6 }
 0x249   : > { %v1241_v5 = vsel %vm1238_vm10, %v1240_v60, %v1236_v17  ;;  %1509 = vrcp.f32 %v1058_v48  ;;  %vm1250_vm13 = vmor %vm1248_vm12, %vm1249_vm11  ;;  %v1269_v55 = vand.u32 2147483648, %v1058_v48  ;;  %v1267_v8 = vand.u32 2147483647, %v1058_v48 }
 0x24a   : > { %v1314_v45 = vmul.f32 %v2124_v13, %v1241_v5  ;;  %v1245_v7 = vsub.f32 1.0, %v1244_v15  ;;  %vm1263_vm0 = vweird.f32 %v1058_v48 }
 0x24b   : > { %v1270_v30 = vor.u32 1.1754944e-38, %v1269_v55  ;;  %vm1268_vm3 = vcmp.eq.f32.partialorder %v1267_v8, 8.507059e+37 }
 0x24c   : > { %v1346_v0 = vsel %vm899_vm1, %v1314_v45, %v1330_v52  ;;  %v1246_v14 = vmul.f32 %v1508_v6, %v1245_v7 }
 0x24d   : > { %1362 = vst [vmem:[%s2169_s4 + $0x58] sm:$0xff] %v1346_v0 }
 0x24e   : > { %v1247_v27 = vadd.f32 %v1508_v6, %v1246_v14 }
 0x24f   : > { %v1510_v51 = vpop.eup %1509 }
 0x250   : > { %v1251_v40 = vsel %vm1250_vm13, %v1508_v6, %v1247_v27  ;;  %v1259_v54 = vmul.f32 %v1510_v51, %v1058_v48  ;;  %v1060_v29 = vpop.xlane.xlu0 %1059  ;;  %vm1264_vm15 = vweird.f32 %v1510_v51 }
 0x251   : > { %v1256_v10 = vsel %vm1253_vm14, %v1255_v35, %v1251_v40  ;;  %1511 = vrcp.f32 %v1060_v29  ;;  %vm1265_vm2 = vmor %vm1263_vm0, %vm1264_vm15  ;;  %v1284_v59 = vand.u32 2147483648, %v1060_v29  ;;  %v1282_v61 = vand.u32 2147483647, %v1060_v29 }
 0x252   : > { %v1315_v37 = vmul.f32 %v2132_v23, %v1256_v10  ;;  %v1260_v13 = vsub.f32 1.0, %v1259_v54  ;;  %vm1278_vm5 = vweird.f32 %v1060_v29 }
 0x253   : > { %v1285_v49 = vor.u32 1.1754944e-38, %v1284_v59  ;;  %vm1283_vm8 = vcmp.eq.f32.partialorder %v1282_v61, 8.507059e+37 }
 0x254   : > { %v1347_v56 = vsel %vm899_vm1, %v1315_v37, %v1331_v34  ;;  %v1261_v4 = vmul.f32 %v1510_v51, %v1260_v13 }
 0x255   : > { %1363 = vst [vmem:[%s2169_s4 + $0x60] sm:$0xff] %v1347_v56 }
 0x256   : > { %v1262_v33 = vadd.f32 %v1510_v51, %v1261_v4 }
 0x257   : > { %v1512_v26 = vpop.eup %1511 }
 0x258   : > { %v1266_v36 = vsel %vm1265_vm2, %v1510_v51, %v1262_v33  ;;  %v1274_v12 = vmul.f32 %v1512_v26, %v1060_v29  ;;  %v1062_v20 = vpop.xlane.xlu1 %1061  ;;  %vm1279_vm4 = vweird.f32 %v1512_v26 }
 0x259   : > { %v1271_v50 = vsel %vm1268_vm3, %v1270_v30, %v1266_v36  ;;  %1513 = vrcp.f32 %v1062_v20  ;;  %vm1280_vm6 = vmor %vm1278_vm5, %vm1279_vm4  ;;  %v1299_v25 = vand.u32 2147483648, %v1062_v20  ;;  %v1297_v32 = vand.u32 2147483647, %v1062_v20 }
 0x25a   : > { %v1316_v9 = vmul.f32 %v2140_v42, %v1271_v50  ;;  %v1275_v23 = vsub.f32 1.0, %v1274_v12  ;;  %vm1293_vm10 = vweird.f32 %v1062_v20 }
 0x25b   : > { %v1300_v24 = vor.u32 1.1754944e-38, %v1299_v25  ;;  %vm1298_vm12 = vcmp.eq.f32.partialorder %v1297_v32, 8.507059e+37 }
 0x25c   : > { %v1348_v3 = vsel %vm899_vm1, %v1316_v9, %v1332_v39  ;;  %v1276_v57 = vmul.f32 %v1512_v26, %v1275_v23 }
 0x25d   : > { %1364 = vst [vmem:[%s2169_s4 + $0x68] sm:$0xff] %v1348_v3 }
 0x25e   : > { %v1277_v16 = vadd.f32 %v1512_v26, %v1276_v57 }
 0x25f   : > { %v1514_v18 = vpop.eup %1513 }
 0x260   : > { %v1281_v22 = vsel %vm1280_vm6, %v1512_v26, %v1277_v16  ;;  %v1289_v11 = vmul.f32 %v1514_v18, %v1062_v20  ;;  %vm1294_vm9 = vweird.f32 %v1514_v18 }
 0x261   : > { %v1286_v44 = vsel %vm1283_vm8, %v1285_v49, %v1281_v22  ;;  %vm1295_vm11 = vmor %vm1293_vm10, %vm1294_vm9 }
 0x262   : > { %v1317_v43 = vmul.f32 %v2148_v58, %v1286_v44  ;;  %v1290_v42 = vsub.f32 1.0, %v1289_v11 }
 0x264   : > { %v1349_v47 = vsel %vm899_vm1, %v1317_v43, %v1333_v1  ;;  %v1291_v38 = vmul.f32 %v1514_v18, %v1290_v42 }
 0x265   : > { %1365 = vst [vmem:[%s2169_s4 + $0x70] sm:$0xff] %v1349_v47 }
 0x266   : > { %v1292_v28 = vadd.f32 %v1514_v18, %v1291_v38 }
 0x268   : > { %v1296_v2 = vsel %vm1295_vm11, %v1514_v18, %v1292_v28 }
 0x269   : > { %v1301_v31 = vsel %vm1298_vm12, %v1300_v24, %v1296_v2 }
 0x26a   : > { %v1318_v6 = vmul.f32 %v2153_v41, %v1301_v31 }
 0x26c   : > { %v1350_v58 = vsel %vm899_vm1, %v1318_v6, %v1334_v19 }
 0x26d   : > { %1366 = vst [vmem:[%s2169_s4 + $0x78] sm:$0xff] %v1350_v58 }
 0x26e PF: > { %s13_s12 = sadd.s32 1, %s1521_s12  }
 0x26f   : > { %p10_p4 = scmp.ge.s32.totalorder %s13_s12, 4  }
 0x271   :  { %12 = sbr.rel (!%p10_p4) target bundleno = 1 (0x1), region = 62 }

</bundles_post_ra>
